<compile_context>
chip_gen: v7x
topology: tpu7x:2x2x1
jax: 0.10.0
libtpu: 0.0.40
codegen_flags: <defaults>
</compile_context>

<pallas_src>
import numpy as np
import jax
import jax.numpy as jnp
from jax.experimental import pallas as pl
from jax.experimental.pallas import tpu as pltpu

TWO_PI = 2.0 * np.pi


# ----------------------------------------------------------------------------
# Pallas kernel (per (batch, HW-tile) grid point), channel-major layout.
# Refs (after leading-dim squeeze):
#   g_ref : [3, HW_TILE]  rows = (x, y, 1) pixel coordinates (lane-dense)
#   f_ref : [C, 3]        2*pi * [freq_x, freq_y, phase] for this batch (f32)
#   w_ref : [C, C]        amplitude-scaled mixing weight (f32 or bf16)
#   o_ref : [C, HW_TILE]  output block (already NCHW-flattened)
# ----------------------------------------------------------------------------
def synthesis_input_kernel(g_ref, f_ref, w_ref, o_ref):
    # Linear term on the MXU: s[c, p] = 2*pi*(fx[c]*x[p] + fy[c]*y[p] + phase[c])
    s = jnp.dot(f_ref[...], g_ref[...], preferred_element_type=jnp.float32)
    # TODO(synk): if bundle dumps confirm the VALU sine polynomial is the
    # binding slot, replace jnp.sin with a range-reduced minimax polynomial
    # exploiting the bounded argument range (keep the linear term on the MXU).
    feat = jnp.sin(s)                      # amplitudes are folded into w_ref
    o_ref[...] = jnp.dot(w_ref[...], feat.astype(w_ref.dtype),
                         preferred_element_type=jnp.float32).astype(o_ref.dtype)


# ----------------------------------------------------------------------------
# Parameter / buffer construction (deterministic, mirrors __init__ shapes).
# ----------------------------------------------------------------------------
def make_params(key, w_dim, channels, bandwidth):
    k1, k2, k3 = jax.random.split(key, 3)
    freqs = jax.random.normal(k1, (channels, 2), jnp.float32)
    radii = jnp.sqrt(jnp.sum(freqs * freqs, axis=1, keepdims=True))
    freqs = freqs / (radii * jnp.exp(radii ** 2) ** 0.25)
    freqs = freqs * bandwidth
    phases = jax.random.uniform(k2, (channels,), jnp.float32) - 0.5
    weight = jax.random.normal(k3, (channels, channels), jnp.float32)
    # FullyConnectedLayer(w_dim, 4, weight_init=0, bias_init=[1,0,0,0])
    aff_w = jnp.zeros((4, w_dim), jnp.float32)             # weight_init = 0
    aff_b = jnp.array([1.0, 0.0, 0.0, 0.0], jnp.float32)   # bias_init
    transform = jnp.eye(3, dtype=jnp.float32)              # registered buffer
    return dict(freqs=freqs, phases=phases, weight=weight,
                aff_w=aff_w, aff_b=aff_b, transform=transform)


# ----------------------------------------------------------------------------
# Plain-JAX glue shared by the Pallas path and the reference path.
# ----------------------------------------------------------------------------
def _prepare_operands(w, params, size, sampling_rate, bandwidth):
    B, w_dim = w.shape
    C = params['freqs'].shape[0]
    W_sz, H_sz = int(size[0]), int(size[1])

    # affine layer (linear): t = w @ (W * gain).T + b,  gain = 1/sqrt(in)
    gain = 1.0 / np.sqrt(w_dim)
    t = w @ (params['aff_w'] * gain).T + params['aff_b'][None, :]       # [B, 4]
    # NOTE: matches torch exactly (no epsilon); zero-init bias [1,0,0,0] keeps
    # the norm away from zero at init.
    t = t / jnp.linalg.norm(t[:, :2], axis=1, keepdims=True)
    t0, t1, t2, t3 = t[:, 0], t[:, 1], t[:, 2], t[:, 3]

    # transforms = m_r @ m_t @ eye(3); only rows 0..1 matter.
    T2 = jnp.stack([jnp.stack([t0, -t1], axis=-1),
                    jnp.stack([t1,  t0], axis=-1)], axis=-2)            # [B, 2, 2]
    Ttr = jnp.stack([-t0 * t2 + t1 * t3,
                     -t1 * t2 - t0 * t3], axis=-1)                      # [B, 2]
    base = params['transform']                                          # identity buffer
    T2 = jnp.einsum('bij,jk->bik', T2, base[:2, :2])

    freqs0 = params['freqs']                                            # [C, 2]
    phases_b = params['phases'][None, :] + jnp.einsum('ck,bk->bc', freqs0, Ttr)
    freqs_b = jnp.einsum('ck,bkj->bcj', freqs0, T2)                     # [B, C, 2]
    amps = jnp.clip(
        1.0 - (jnp.linalg.norm(freqs_b, axis=2) - bandwidth)
        / (sampling_rate / 2.0 - bandwidth), 0.0, 1.0)                  # [B, C]

    # F.affine_grid(theta, [1, 1, H, W], align_corners=False)
    sx = 0.5 * size[0] / sampling_rate
    sy = 0.5 * size[1] / sampling_rate
    xs = sx * ((2.0 * jnp.arange(W_sz, dtype=jnp.float32) + 1.0) / W_sz - 1.0)
    ys = sy * ((2.0 * jnp.arange(H_sz, dtype=jnp.float32) + 1.0) / H_sz - 1.0)
    gx = jnp.broadcast_to(xs[None, :], (H_sz, W_sz)).reshape(-1)
    gy = jnp.broadcast_to(ys[:, None], (H_sz, W_sz)).reshape(-1)
    grids = jnp.stack([gx, gy], axis=-1)                                # [HW, 2]

    w_mix = params['weight'] / np.sqrt(C)                               # [C_out, C_in]
    return grids, freqs_b, phases_b, amps, w_mix, (B, H_sz, W_sz, C)


# ----------------------------------------------------------------------------
# VMEM sizing: derive the compiler limit and the tile budget from the chip.
#   v5e / v6e (128 MiB VMEM): ~100 MiB limit, ~64 MiB tile budget.
#   v7x       ( 64 MiB VMEM): ~40  MiB limit, ~26 MiB tile budget.
# ----------------------------------------------------------------------------
def _vmem_config():
    cap = None
    try:
        cap = int(pltpu.get_tpu_info().vmem_capacity_bytes)
    except Exception:
        cap = None
    if cap is None:
        cap = 64 << 20  # conservative default (v7x per-TensorCore VMEM)
    if cap >= (128 << 20):
        return 100 << 20, 64 << 20
    return 40 << 20, 26 << 20


# ----------------------------------------------------------------------------
# HW tile selection: multiple of 128, as large as the VMEM budget allows,
# preferring an exact divisor of HW (no partial boundary block, no pad/slice).
# ----------------------------------------------------------------------------
def _pick_hw_tile(hw, max_tile, min_tiles):
    if hw <= 128:
        return hw                       # single full-extent block is allowed
    limit = min(max_tile, hw)
    if min_tiles > 1 and hw >= 2 * 128:
        limit = min(limit, hw // min_tiles)   # ensure >= min_tiles grid points
    limit = max(128, (limit // 128) * 128)
    if hw % 128 == 0:
        # Largest multiple-of-128 divisor of hw that fits the budget.
        for t in range(limit, 127, -128):
            if hw % t == 0:
                return t
    # Non-divisible case: Pallas masks the partial boundary block (the OOB
    # coordinate lanes feed sin -> bounded, and their output lanes are masked).
    return limit


# ----------------------------------------------------------------------------
# Pallas-backed forward.
# ----------------------------------------------------------------------------
def synthesis_input_forward(w, params, *, size, sampling_rate, bandwidth,
                            hw_tile=None, out_dtype=jnp.float32,
                            use_bf16_matmul=None):
    grids, freqs_b, phases_b, amps, w_mix, (B, H, W, C) = _prepare_operands(
        w, params, size, sampling_rate, bandwidth)
    HW = H * W

    # bf16 operands for the C x C matmul pay off only at production channel
    # counts; f32 is kept by default at small C (tight 1e-4 reference check).
    if use_bf16_matmul is None:
        use_bf16_matmul = C >= 256
    w_dtype = jnp.bfloat16 if use_bf16_matmul else jnp.float32
    out_itemsize = jnp.dtype(out_dtype).itemsize
    w_itemsize = jnp.dtype(w_dtype).itemsize

    vmem_limit, tile_budget = _vmem_config()
    # Per-pixel VMEM bytes: coord block ([3,*] padded to 8 sublanes, 2 buffers)
    # + output block (2 buffers) + f32 intermediates (s and sin(s)).
    per_px = 2 * 8 * 4 + 2 * C * out_itemsize + 2 * C * 4
    # Resident (single-buffered) per-batch operands: [C,3] lane-padded to 128
    # and the [C,C] amplitude-scaled weight.
    fixed = C * 128 * 4 + C * C * w_itemsize
    max_tile = max(128, ((tile_budget - fixed) // per_px // 128) * 128)
    min_tiles = 2 if B == 1 else 1      # keep both v7x TensorCores busy

    if hw_tile is None:
        hw_tile = _pick_hw_tile(HW, max_tile, min_tiles)
    n_tiles = pl.cdiv(HW, hw_tile)

    # Channel-major, lane-dense operands.
    g_aug = jnp.concatenate(
        [grids, jnp.ones((HW, 1), jnp.float32)], axis=1).T              # [3, HW]
    # Fold 2*pi into freqs/phases; fold amplitudes into the mixing weight
    # (amplitude multiplies the contraction dim, so it commutes exactly).
    # NOTE: the 2*pi fold reassociates f32 arithmetic vs the reference
    # (sin(2*pi*(f.x+phi)) vs sin((2*pi*f).x + 2*pi*phi)); error ~1e-6.
    fpb = TWO_PI * jnp.concatenate(
        [freqs_b, phases_b[:, :, None]], axis=2)                        # [B, C, 3]
    wsc = (w_mix[None, :, :] * amps[:, None, :]).astype(w_dtype)        # [B, C, C]

    cost = pl.CostEstimate(
        flops=int(2 * B * C * (C + 3) * HW),
        transcendentals=int(B * C * HW),
        bytes_accessed=int(B * 3 * HW * 4            # coords (re-read per batch)
                           + B * C * 3 * 4           # folded freqs/phases
                           + B * C * C * w_itemsize  # folded weight
                           + B * C * HW * out_itemsize))

    out = pl.pallas_call(
        synthesis_input_kernel,
        out_shape=jax.ShapeDtypeStruct((B, C, HW), out_dtype),
        grid=(B, n_tiles),
        in_specs=[
            # Pixel coordinates: tiled along HW, shared across batch.
            # (Accepted minor cost: re-DMA'd once per batch; resident f/w per
            #  batch is the right trade at real channel counts.)
            pl.BlockSpec((3, hw_tile), lambda b, t: (0, t)),
            # Per-batch freq/phase and amp-scaled weight: block index is
            # constant across the HW-tile axis -> single-buffer them.
            pl.BlockSpec((None, C, 3), lambda b, t: (b, 0, 0),
                         pipeline_mode=pl.Buffered(1)),
            pl.BlockSpec((None, C, C), lambda b, t: (b, 0, 0),
                         pipeline_mode=pl.Buffered(1)),
        ],
        out_specs=pl.BlockSpec((None, C, hw_tile), lambda b, t: (b, 0, t)),
        compiler_params=pltpu.CompilerParams(
            dimension_semantics=("parallel", "parallel"),
            vmem_limit_bytes=vmem_limit),
        cost_estimate=cost,
    )(g_aug, fpb, wsc)

    # Output is already channel-major: reshape to NCHW [B, C, size[1], size[0]].
    return out.reshape(B, C, H, W)


# ----------------------------------------------------------------------------
# Pure-JAX reference for correctness checking (mirrors the torch forward).
# ----------------------------------------------------------------------------
def synthesis_input_ref(w, params, *, size, sampling_rate, bandwidth):
    grids, freqs_b, phases_b, amps, w_mix, (B, H, W, C) = _prepare_operands(
        w, params, size, sampling_rate, bandwidth)
    x = jnp.einsum('pk,bck->bpc', grids, freqs_b)          # [B, HW, C]
    x = x + phases_b[:, None, :]
    x = jnp.sin(x * TWO_PI) * amps[:, None, :]
    x = x @ w_mix.T
    return x.reshape(B, H, W, C).transpose(0, 3, 1, 2)


if __name__ == "__main__":
    # Small shapes consistent with the module.
    B = 2
    W_DIM = 32
    CHANNELS = 16
    SIZE = (16, 16)          # (size[0]=width, size[1]=height)
    SAMPLING_RATE = 16.0
    BANDWIDTH = 2.0

    key = jax.random.PRNGKey(0)
    kp, kw = jax.random.split(key)
    params = make_params(kp, W_DIM, CHANNELS, BANDWIDTH)
    w = jax.random.normal(kw, (B, W_DIM), jnp.float32)

    out = synthesis_input_forward(
        w, params, size=SIZE, sampling_rate=SAMPLING_RATE, bandwidth=BANDWIDTH)
    out = jax.block_until_ready(out)

    ref = synthesis_input_ref(
        w, params, size=SIZE, sampling_rate=SAMPLING_RATE, bandwidth=BANDWIDTH)
    ref = jax.block_until_ready(ref)

    assert out.shape == (B, CHANNELS, SIZE[1], SIZE[0]), out.shape
    np.testing.assert_allclose(np.asarray(out), np.asarray(ref),
                               rtol=1e-4, atol=1e-4)
    print("KERNEL_OK")
</pallas_src>

<mosaic_0001>
module attributes {stable_mosaic.version = 11 : i64} {
  func.func @synthesis_input_kernel(%arg0: i32, %arg1: i32, %arg2: memref<3x256xf32, #tpu.memory_space<vmem>>, %arg3: memref<1x16x3xf32, #tpu.memory_space<vmem>>, %arg4: memref<1x16x16xf32, #tpu.memory_space<vmem>>, %arg5: memref<1x16x256xf32, #tpu.memory_space<vmem>>) attributes {dimension_semantics = [#tpu.dimension_semantics<parallel>, #tpu.dimension_semantics<parallel>], iteration_bounds = array<i64: 2, 1>, scalar_prefetch = 0 : i64, scratch_operands = 0 : i64, tpu.core_type = #tpu.core_type<tc>, window_params = [{transform_indices = @transform_0, window_bounds = array<i64: 3, 256>}, {pipeline_mode = #tpu.pipeline_mode<synchronous>, transform_indices = @transform_1, window_bounds = array<i64: 1, 16, 3>}, {pipeline_mode = #tpu.pipeline_mode<synchronous>, transform_indices = @transform_2, window_bounds = array<i64: 1, 16, 16>}, {transform_indices = @transform_3, window_bounds = array<i64: 1, 16, 256>}]} {
    %c0 = arith.constant 0 : index
    %c0_0 = arith.constant 0 : index
    %c0_1 = arith.constant 0 : index
    %0 = vector.load %arg3[%c0, %c0_0, %c0_1] : memref<1x16x3xf32, #tpu.memory_space<vmem>>, vector<1x16x3xf32>
    %1 = vector.shape_cast %0 : vector<1x16x3xf32> to vector<16x3xf32>
    %c0_2 = arith.constant 0 : index
    %c0_3 = arith.constant 0 : index
    %2 = vector.load %arg2[%c0_2, %c0_3] : memref<3x256xf32, #tpu.memory_space<vmem>>, vector<3x256xf32>
    %cst = arith.constant dense<0.000000e+00> : vector<16x256xf32>
    %3 = tpu.matmul %1, %2, %cst {dimension_numbers = #tpu.dot_dimension_numbers<[1], [0], [0], [1], [0, 0, 1, 1], [], []>} : vector<16x3xf32>, vector<3x256xf32>, vector<16x256xf32> -> vector<16x256xf32>
    %4 = math.sin %3 : vector<16x256xf32>
    %c0_4 = arith.constant 0 : index
    %c0_5 = arith.constant 0 : index
    %c0_6 = arith.constant 0 : index
    %5 = vector.load %arg4[%c0_4, %c0_5, %c0_6] : memref<1x16x16xf32, #tpu.memory_space<vmem>>, vector<1x16x16xf32>
    %6 = vector.shape_cast %5 : vector<1x16x16xf32> to vector<16x16xf32>
    %cst_7 = arith.constant dense<0.000000e+00> : vector<16x256xf32>
    %7 = tpu.matmul %6, %4, %cst_7 {dimension_numbers = #tpu.dot_dimension_numbers<[1], [0], [0], [1], [0, 0, 1, 1], [], []>} : vector<16x16xf32>, vector<16x256xf32>, vector<16x256xf32> -> vector<16x256xf32>
    %c0_8 = arith.constant 0 : index
    %c0_9 = arith.constant 0 : index
    %c0_10 = arith.constant 0 : index
    %8 = vector.load %arg5[%c0_8, %c0_9, %c0_10] : memref<1x16x256xf32, #tpu.memory_space<vmem>>, vector<1x16x256xf32>
    %9 = vector.shape_cast %8 : vector<1x16x256xf32> to vector<16x256xf32>
    %10 = vector.shape_cast %7 : vector<16x256xf32> to vector<1x16x256xf32>
    tpu.vector_store %arg5[%c0_8, %c0_9, %c0_10], %10 {strides = array<i32>} : memref<1x16x256xf32, #tpu.memory_space<vmem>>, vector<1x16x256xf32>,
    return
  }
  func.func @transform_0(%arg0: i32, %arg1: i32) -> (i32, i32) {
    %c0_i32 = arith.constant 0 : i32
    %c0_i32_0 = arith.constant 0 : i32
    return %c0_i32, %arg1 : i32, i32
  }
  func.func @transform_1(%arg0: i32, %arg1: i32) -> (i32, i32, i32) {
    %c0_i32 = arith.constant 0 : i32
    %c0_i32_0 = arith.constant 0 : i32
    %c0_i32_1 = arith.constant 0 : i32
    return %arg0, %c0_i32, %c0_i32_0 : i32, i32, i32
  }
  func.func @transform_2(%arg0: i32, %arg1: i32) -> (i32, i32, i32) {
    %c0_i32 = arith.constant 0 : i32
    %c0_i32_0 = arith.constant 0 : i32
    %c0_i32_1 = arith.constant 0 : i32
    return %arg0, %c0_i32, %c0_i32_0 : i32, i32, i32
  }
  func.func @transform_3(%arg0: i32, %arg1: i32) -> (i32, i32, i32) {
    %c0_i32 = arith.constant 0 : i32
    %c0_i32_0 = arith.constant 0 : i32
    return %arg0, %c0_i32, %arg1 : i32, i32, i32
  }
}

</mosaic_0001>

<bundles_post_ra>
// kernel: tpu_custom_call.1
= control target key start
LH: loop header
LB: loop body
LE: loop exit
PB: predicated region body
PF: predicated region fallthrough
CT: control target
= control target key end

     0   :  { %8 = vsyncpa [#allocation3], 0  ;;  %s1595_s0 = inlined_call_operand.vmem [shape: f32[3,256], index: 0, kind: input, shape index: {}]   ;;  %s1596_s1 = inlined_call_operand.vmem [shape: f32[2,16,3], index: 1, kind: input, shape index: {}]   ;;  %s1597_s2 = inlined_call_operand.vmem [shape: f32[2,16,16], index: 2, kind: input, shape index: {}]   ;;  %s1598_s3 = inlined_call_operand.hbm [shape: f32[2,16,256], index: 3, kind: output, shape index: {}]  }
   0x1   :  { %10 = vsyncpa [#allocation3 + $0x1], 0  ;;  %s1199_s12 = smov 0   ;;  %s1201_s13 = smov 0  }
   0x2   :  { %s1203_s14 = smov 0   ;;  %s1205_s15 = smov 0  }
   0x3   :  { %s1207_s16 = smov 0   ;;  %s1209_s17 = smov 0  }
   0x4 LB: > { %s948_s18 = sadd.s32 4294967295, %s1167_s17   ;;  %s949_s19 = sadd.s32 4294967294, %s1167_s17   ;;  %s1167_s17 = sphi %s1209_s17, %s16_s17   ;;  %s1163_s16 = sphi %s1207_s16, %s1611_s16   ;;  %s1159_s15 = sphi %s1205_s15, %s1610_s15   ;;  %s1155_s14 = sphi %s1203_s14, %s1609_s14   ;;  %s1151_s13 = sphi %s1201_s13, %s1608_s13   ;;  %s1147_s12 = sphi %s1199_s12, %s1607_s12  }
   0x5   : > { %s28_s20 = sadd.s32 1, %s1163_s16  ;;  %s115_s21 = sadd.s32 1, %s1155_s14 }
   0x6   : > { %p30_p0 = scmp.ge.s32.totalorder %s28_s20, 2  ;;  %p125_p1 = scmp.ne.s32.totalorder %s1155_s14, %s1151_s13 }
   0x7   : > { %p126_p2 = scmp.eq.s32.totalorder %s948_s18, 1  ;;  %p131_p3 = scmp.ne.s32.totalorder %s1151_s13, %s1147_s12 }
   0x8   : > { %s1613_s20 = smov (%p30_p0, %s28_s20), 0  ;;  %p132_p5 = scmp.eq.s32.totalorder %s949_s19, 1 }
   0x9   : > { %p1239_p4 = por %p126_p2, %p125_p1  ;;  %s110_s23 = ssub.s32 %s1163_s16, %s1613_s20 }
   0xa   : > { %p952_p6 = scmp.ge.s32.totalorder %s1167_s17, 1  ;;  %p113_p7 = scmp.eq.s32.totalorder %s110_s23, 0 }
   0xb   : > { %p1246_p8 = por %p132_p5, %p131_p3  ;;  %p175_p9 = scmp.lt.s32.totalorder %s1167_s17, 3 }
   0xc   : > { %s1252_s25 = scalar_select %p113_p7, %s1155_s14, %s115_s21  }
   0xd   : > { %p176_p10 = pnand %p952_p6, %p175_p9 }
   0xe   : > { %v228_v0 = vld [vmem:[%s1595_s0] sm:$0x77] (!%p176_p10)  ;;  %vm238_vm0 = vcmask (!%p176_p10), 1042432   ;;  %p215_p11 = scmp.lt.s32.totalorder (!%p176_p10), %s1159_s15, 1  ;;  %v1169_v2 = vmov (!%p176_p10), 0.0   ;;  %vm231_vm1 = vcmask (!%p176_p10), 23552  }
   0xf   : > { %179 = sbr.rel (%p176_p10) target bundleno = 603 (0x25b), region = 32  ;;  %v230_v1 = vcombine.high (!%p176_p10), %v228_v0, %v228_v0  ;;  %307 = vmatprep.mubr.f32.mxu0 (!%p176_p10), %v1169_v2  ;;  %809 = vmatprep.mubr.f32.mxu1 (!%p176_p10), %v1169_v2  ;;  %v1170_v37 = vmov (!%p176_p10), 683565275   ;;  %v1171_v41 = vmov (!%p176_p10), 2475754826   ;;  %s206_s9 = sand.u32 (!%p176_p10), 1, %s1151_s13  }
  0x10   : > { %v1172_v43 = vmov (!%p176_p10), 2131351028   ;;  %v1173_v45 = vmov (!%p176_p10), 2102212464   ;;  %v1174_v47 = vmov (!%p176_p10), 920167782  }
  0x11   : > { %958 = vmatprep.subr.msk.mxu0 (!%p176_p10), %vm238_vm0, %v230_v1  ;;  %v1175_v54 = vmov (!%p176_p10), 1326507024   ;;  %s953_s10 = sshll.u32 (!%p176_p10), %s206_s9, 5  ;;  %s987_s19 = sshll.u32 (!%p176_p10), %s1159_s15, 9 }
  0x12   : > { %959 = vmatpush1.msk.msra.mxu0 (!%p176_p10), %vm238_vm0, %v228_v0  ;;  %s208_s11 = scalar_lea.vmem (!%p176_p10), [#allocation2], %s953_s10  ;;  %s1547_s26 = scalar_lea.hbm (!%p176_p10), %s1598_s3, %s987_s19 }
  0x13   : > { %s842_s18 = sshll.u32 (!%p176_p10), %s208_s11, 4  ;;  %s1549_s27 = scalar_lea.sflag (!%p176_p10), [#allocation3], %s206_s9  ;;  %s1542_s18 = int_to_ptr.vmem [resolvable:$true] %s842_s18 }
  0x16   : > { %s1261_s28 = scalar_select %p215_p11, %s1159_s15, 1 }
  0x17   : > { %s1176_s15 = smov [#allocation2]  }
  0x18   : > { %s985_s29 = sshll.u32 %s1261_s28, 4  ;;  %s1089_s28 = scalar_lea.vmem %s1542_s18, 512 }
  0x19   : > { %s219_s5 = scalar_lea.vmem %s1596_s1, %s985_s29  ;;  %s224_s8 = scalar_lea.vmem %s1597_s2, %s985_s29 }
  0x1a   : > { %v226_v3 = vld [vmem:[%s219_s5] sm:$0xff]  ;;  %v227_v4 = vld [vmem:[%s219_s5 + $0x8] sm:$0xff]  ;;  %p1090_p12 = scmp.ne.s32.totalorder %s1542_s18, %s1089_s28  ;;  %s1093_s29 = sshll.u32 %s1176_s15, 4  ;;  %s1094_s29 = int_to_ptr.vmem [resolvable:$false] %s1093_s29 }
  0x1b   : > { %960 = vmatmul.mubr.msk.f32.vlgmr.msra.gmra.mrb[0].mxu0 %vm231_vm1, %v226_v3  ;;  %s1095_s30 = scalar_lea.vmem %s1094_s29, 1024  ;;  %p1096_p1 = scmp.lt.s32.totalorder %s1542_s18, %s1094_s29 }
  0x1c   : > { %313 = vmatprep.mubr.f32.mxu0 %v1169_v2  ;;  %p1091_p13 = pnand %p1090_p12, %p1239_p4  ;;  %p1097_p2 = scmp.lt.s32.totalorder %s1095_s30, %s1089_s28 }
  0x1e   : > { %p1092_p0 = pneg %p1091_p13  ;;  %p1098_p3 = por %p1097_p2, %p1096_p1 }
  0x1f   : > { %961 = vmatmul.mubr.msk.f32.gmra.mrb[2].mxu0 %vm231_vm1, %v227_v4 }
  0x20   : > { %p1099_p5 = pnand %p1098_p3, %p1092_p0 }
  0xee   : > { %v1270_v5 = vpop.f32.mrb[0].mxu0 }
  0xef   : > { %v320_v6 = vand.u32 2147483647, %v1270_v5  ;;  %v323_v7 = vand.u32 2139095040, %v1270_v5  ;;  %v1274_v8 = vpop.f32.mrb[1].mxu0 }
  0xf0   : > { %v424_v9 = vand.u32 2147483647, %v1274_v8  ;;  %v427_v10 = vand.u32 2139095040, %v1274_v8 }
  0xf1   : > { %v324_v11 = vshrl.u32 %v323_v7, 23  ;;  %v327_v12 = vand.u32 8388607, %v320_v6 }
  0xf2   : > { %v428_v13 = vshrl.u32 %v427_v10, 23  ;;  %v431_v14 = vand.u32 8388607, %v424_v9  ;;  %v1282_v15 = vpop.f32.mrb[2].mxu0 }
  0xf3   : > { %v962_v16 = vadd.s32 4294967169, %v324_v11  ;;  %v528_v17 = vand.u32 2147483647, %v1282_v15  ;;  %v1285_v18 = vpop.f32.mrb[3].mxu0  ;;  %v531_v20 = vand.u32 2139095040, %v1282_v15  ;;  %v328_v21 = vor.u32 8388608, %v327_v12 }
  0xf4   : > { %v966_v19 = vadd.s32 4294967169, %v428_v13  ;;  %v432_v23 = vor.u32 8388608, %v431_v14 }
  0xf5   : > { %v330_v22 = vadd.s32 1, %v962_v16  ;;  %v532_v25 = vshrl.u32 %v531_v20, 23  ;;  %v1290_v26 = vand.u32 8388607, %v528_v17  ;;  %v1292_v32 = vshll.u32 %v328_v21, 8 }
  0xf6   : > { %v434_v24 = vadd.s32 1, %v966_v19  ;;  %v1296_v34 = vshll.u32 %v432_v23, 8 }
  0xf7   : > { %vm331_vm2 = vcmp.gt.s32.totalorder %v330_v22, 0  ;;  %v970_v28 = vadd.s32 4294967169, %v532_v25  ;;  %v536_v35 = vor.u32 8388608, %v1290_v26 }
  0xf8   : > { %v332_v27 = vsel %vm331_vm2, %v330_v22, 0  ;;  %vm435_vm3 = vcmp.gt.s32.totalorder %v434_v24, 0 }
  0xf9   : > { %v333_v29 = vshrl.u32 %v332_v27, 5  ;;  %v334_v30 = vand.u32 31, %v332_v27  ;;  %v436_v31 = vsel %vm435_vm3, %v434_v24, 0  ;;  %v1300_v40 = vadd.s32 1, %v970_v28 }
  0xfa   : > { %v1294_v33 = vshrl.u32 %v436_v31, 5  ;;  %v438_v39 = vand.u32 31, %v436_v31 }
  0xfb   : > { %v335_v36 = vsub.s32 32, %v334_v30  ;;  %v337_v38 = vshll.u32 %v1170_v37, %v334_v30  ;;  %v340_v42 = vshll.u32 %v1171_v41, %v334_v30  ;;  %v343_v44 = vshll.u32 %v1172_v43, %v334_v30 }
  0xfc   : > { %v346_v46 = vshll.u32 %v1173_v45, %v334_v30  ;;  %v349_v48 = vshll.u32 %v1174_v47, %v334_v30  ;;  %vm352_vm4 = vcmp.lt.s32.totalorder %v333_v29, 1  ;;  %vm353_vm5 = vcmp.lt.s32.totalorder %v333_v29, 2 }
  0xfd   : > { %v338_v49 = vshrl.u32 %v1171_v41, %v335_v36  ;;  %v341_v50 = vshrl.u32 %v1172_v43, %v335_v36  ;;  %v344_v51 = vshrl.u32 %v1173_v45, %v335_v36  ;;  %v336_v52 = vshrl.u32 %v1170_v37, %v335_v36 }
  0xfe   : > { %v347_v53 = vshrl.u32 %v1174_v47, %v335_v36  ;;  %v350_v55 = vshrl.u32 %v1175_v54, %v335_v36  ;;  %v439_v59 = vsub.s32 32, %v438_v39  ;;  %vm354_vm6 = vcmp.lt.s32.totalorder %v333_v29, 3 }
  0xff   : > { %v339_v56 = vor.u32 %v338_v49, %v337_v38  ;;  %v342_v57 = vor.u32 %v341_v50, %v340_v42  ;;  %v345_v58 = vor.u32 %v344_v51, %v343_v44  ;;  %vm355_vm7 = vcmp.lt.s32.totalorder %v333_v29, 4 }
 0x100   : > { %v348_v60 = vor.u32 %v347_v53, %v346_v46  ;;  %v351_v61 = vor.u32 %v350_v55, %v349_v48  ;;  %v441_v10 = vshll.u32 %v1170_v37, %v438_v39  ;;  %v442_v13 = vshrl.u32 %v1171_v41, %v439_v59 }
 0x101   : > { %v356_v62 = vsel %vm352_vm4, %v336_v52, %v339_v56  ;;  %v357_v63 = vsel %vm355_vm7, %v345_v58, 2102212464  ;;  %v360_v0 = vsel %vm352_vm4, %v339_v56, %v342_v57  ;;  %v364_v1 = vsel %vm352_vm4, %v342_v57, %v345_v58 }
 0x102   : > { %v358_v3 = vsel %vm354_vm6, %v342_v57, %v357_v63  ;;  %v361_v4 = vsel %vm355_vm7, %v348_v60, 920167782  ;;  %v365_v7 = vsel %vm355_vm7, %v351_v61, 1326507024  ;;  %v444_v14 = vshll.u32 %v1171_v41, %v438_v39 }
 0x103   : > { %v362_v11 = vsel %vm354_vm6, %v345_v58, %v361_v4  ;;  %v366_v12 = vsel %vm354_vm6, %v348_v60, %v365_v7  ;;  %v359_v16 = vsel %vm353_vm5, %v356_v62, %v358_v3  ;;  %v445_v21 = vshrl.u32 %v1172_v43, %v439_v59 }
 0x104   : > { %v363_v19 = vsel %vm353_vm5, %v360_v0, %v362_v11  ;;  %v367_v20 = vsel %vm353_vm5, %v364_v1, %v366_v12  ;;  %v443_v27 = vor.u32 %v442_v13, %v441_v10  ;;  %v447_v30 = vshll.u32 %v1172_v43, %v438_v39 }
 0x105   : > { %v1323_v22 = vmul.u32.u64.low %v1292_v32, %v367_v20  ;;  %v1324_v23 = vmul.u32.u64.high %v1292_v32, %v367_v20, %v1323_v22  ;;  %v1327_v24 = vmul.u32.u64.low %v1292_v32, %v363_v19  ;;  %v1328_v25 = vmul.u32.u64.high %v1292_v32, %v363_v19, %v1327_v24 }
 0x106   : > { %v446_v28 = vor.u32 %v445_v21, %v444_v14  ;;  %v448_v31 = vshrl.u32 %v1173_v45, %v439_v59  ;;  %v440_v29 = vshrl.u32 %v1170_v37, %v439_v59  ;;  %v450_v36 = vshll.u32 %v1173_v45, %v438_v39 }
 0x107   : > { %v451_v38 = vshrl.u32 %v1174_v47, %v439_v59  ;;  %v454_v42 = vshrl.u32 %v1175_v54, %v439_v59  ;;  %v375_v44 = vmul.u32 %v1292_v32, %v359_v16  ;;  %v453_v48 = vshll.u32 %v1174_v47, %v438_v39 }
 0x108   : > { %v449_v46 = vor.u32 %v448_v31, %v447_v30  ;;  %vm456_vm8 = vcmp.lt.s32.totalorder %v1294_v33, 1  ;;  %vm377_vm9 = vc.u32 %v1324_v23, %v1327_v24  ;;  %v378_v49 = vadd.s32 1, %v1328_v25 }
 0x109   : > { %v452_v50 = vor.u32 %v451_v38, %v450_v36  ;;  %vm457_vm10 = vcmp.lt.s32.totalorder %v1294_v33, 2  ;;  %v455_v51 = vor.u32 %v454_v42, %v453_v48  ;;  %vm458_vm11 = vcmp.lt.s32.totalorder %v1294_v33, 3 }
 0x10a   : > { %vm459_vm12 = vcmp.lt.s32.totalorder %v1294_v33, 4  ;;  %v464_v52 = vsel %vm456_vm8, %v443_v27, %v446_v28  ;;  %v379_v32 = vsel %vm377_vm9, %v378_v49, %v1328_v25  ;;  %v468_v55 = vsel %vm456_vm8, %v446_v28, %v449_v46 }
 0x10b   : > { %v461_v53 = vsel %vm459_vm12, %v449_v46, 2102212464  ;;  %v465_v39 = vsel %vm459_vm12, %v452_v50, 920167782  ;;  %v380_v56 = vadd.s32 %v379_v32, %v375_v44  ;;  %v460_v57 = vsel %vm456_vm8, %v440_v29, %v443_v27 }
 0x10c   : > { %v466_v58 = vsel %vm458_vm11, %v449_v46, %v465_v39  ;;  %v469_v59 = vsel %vm459_vm12, %v455_v51, 1326507024  ;;  %v462_v60 = vsel %vm458_vm11, %v446_v28, %v461_v53  ;;  %vm539_vm13 = vcmp.gt.s32.totalorder %v1300_v40, 0 }
 0x10d   : > { %v467_v61 = vsel %vm457_vm10, %v464_v52, %v466_v58  ;;  %v470_v62 = vsel %vm458_vm11, %v452_v50, %v469_v59  ;;  %v381_v63 = vadd.s32 536870912, %v380_v56  ;;  %v540_v10 = vsel %vm539_vm13, %v1300_v40, 0 }
 0x10e   : > { %v471_v0 = vsel %vm457_vm10, %v468_v55, %v470_v62  ;;  %v1353_v1 = vmul.u32.u64.low %v1296_v34, %v467_v61  ;;  %v1354_v3 = vmul.u32.u64.high %v1296_v34, %v467_v61, %v1353_v1  ;;  %v635_v11 = vand.u32 2139095040, %v1285_v18 }
 0x10f   : > { %v1358_v4 = vmul.u32.u64.low %v1296_v34, %v471_v0  ;;  %v1359_v7 = vmul.u32.u64.high %v1296_v34, %v471_v0, %v1358_v4  ;;  %v1363_v12 = vshrl.u32 %v381_v63, 30  ;;  %v463_v13 = vsel %vm457_vm10, %v460_v57, %v462_v60 }
 0x110   : > { %v542_v14 = vand.u32 31, %v540_v10  ;;  %v482_v19 = vadd.s32 1, %v1354_v3  ;;  %v1371_v21 = vshll.u32 %v536_v35, 8  ;;  %v479_v22 = vmul.u32 %v1296_v34, %v463_v13 }
 0x111   : > { %v383_v16 = vshll.u32 %v1363_v12, 30  ;;  %vm481_vm14 = vc.u32 %v1359_v7, %v1353_v1  ;;  %v541_v40 = vshrl.u32 %v540_v10, 5  ;;  %v636_v25 = vshrl.u32 %v635_v11, 23 }
 0x112   : > { %v543_v20 = vsub.s32 32, %v542_v14  ;;  %v483_v33 = vsel %vm481_vm14, %v482_v19, %v1354_v3  ;;  %v545_v28 = vshll.u32 %v1170_v37, %v542_v14  ;;  %v548_v30 = vshll.u32 %v1171_v41, %v542_v14 }
 0x113   : > { %v1376_v27 = vsub.s32 %v380_v56, %v383_v16  ;;  %v484_v31 = vadd.s32 %v483_v33, %v479_v22  ;;  %v551_v34 = vshll.u32 %v1172_v43, %v542_v14  ;;  %v554_v38 = vshll.u32 %v1173_v45, %v542_v14 }
 0x114   : > { %v546_v26 = vshrl.u32 %v1171_v41, %v543_v20  ;;  %v549_v35 = vshrl.u32 %v1172_v43, %v543_v20  ;;  %v552_v36 = vshrl.u32 %v1173_v45, %v543_v20  ;;  %v555_v42 = vshrl.u32 %v1174_v47, %v543_v20 }
 0x115   : > { %v386_v29 = vsub.s32 0, %v1376_v27  ;;  %v485_v44 = vadd.s32 536870912, %v484_v31  ;;  %v557_v49 = vshll.u32 %v1174_v47, %v542_v14  ;;  %v558_v32 = vshrl.u32 %v1175_v54, %v543_v20 }
 0x116   : > { %v547_v46 = vor.u32 %v546_v26, %v545_v28  ;;  %v550_v48 = vor.u32 %v549_v35, %v548_v30  ;;  %v553_v51 = vor.u32 %v552_v36, %v551_v34  ;;  %v556_v52 = vor.u32 %v555_v42, %v554_v38 }
 0x117   : > { %v963_v50 = vmin.u32 %v386_v29, %v1376_v27  ;;  %v1391_v53 = vshrl.u32 %v485_v44, 30  ;;  %v544_v39 = vshrl.u32 %v1170_v37, %v543_v20  ;;  %vm560_vm15 = vcmp.lt.s32.totalorder %v541_v40, 1 }
 0x118   : > { %v974_v55 = vadd.s32 4294967169, %v636_v25  ;;  %v559_v57 = vor.u32 %v558_v32, %v557_v49  ;;  %vm561_vm0 = vcmp.lt.s32.totalorder %v541_v40, 2  ;;  %vm563_vm1 = vcmp.lt.s32.totalorder %v541_v40, 4 }
 0x119   : > { %v388_v56 = vclz %v963_v50  ;;  %v487_v58 = vshll.u32 %v1391_v53, 30  ;;  %vm562_vm2 = vcmp.lt.s32.totalorder %v541_v40, 3  ;;  %v568_v59 = vsel %vm560_vm15, %v547_v46, %v550_v48 }
 0x11a   : > { %v569_v60 = vsel %vm563_vm1, %v556_v52, 920167782  ;;  %v565_v62 = vsel %vm563_vm1, %v553_v51, 2102212464  ;;  %v572_v0 = vsel %vm560_vm15, %v550_v48, %v553_v51  ;;  %v564_v4 = vsel %vm560_vm15, %v544_v39, %v547_v46 }
 0x11b   : > { %v964_v61 = vadd.s32 4294967294, %v388_v56  ;;  %v570_v63 = vsel %vm562_vm2, %v553_v51, %v569_v60  ;;  %v1396_v3 = vsub.s32 %v484_v31, %v487_v58  ;;  %v573_v11 = vsel %vm563_vm1, %v559_v57, 1326507024 }
 0x11c   : > { %v571_v10 = vsel %vm561_vm0, %v568_v59, %v570_v63  ;;  %v574_v13 = vsel %vm562_vm2, %v556_v52, %v573_v11  ;;  %v566_v22 = vsel %vm562_vm2, %v550_v48, %v565_v62  ;;  %v642_v28 = vadd.s32 1, %v974_v55 }
 0x11d   : > { %vm965_vm3 = vcmp.lt.s32.totalorder %v964_v61, 0  ;;  %v1401_v14 = vmul.u32.u64.low %v1371_v21, %v571_v10  ;;  %v1402_v16 = vmul.u32.u64.high %v1371_v21, %v571_v10, %v1401_v14  ;;  %v490_v20 = vsub.s32 0, %v1396_v3 }
 0x11e   : > { %v391_v19 = vsel %vm965_vm3, 0, %v964_v61  ;;  %v575_v25 = vsel %vm561_vm0, %v572_v0, %v574_v13  ;;  %v567_v35 = vsel %vm561_vm0, %v564_v4, %v566_v22  ;;  %vm643_vm4 = vcmp.gt.s32.totalorder %v642_v28, 0 }
 0x11f   : > { %v396_v33 = vsub.s32 4294967266, %v391_v19  ;;  %v1409_v30 = vmul.u32.u64.low %v1371_v21, %v575_v25  ;;  %v1410_v31 = vmul.u32.u64.high %v1371_v21, %v575_v25, %v1409_v30  ;;  %v967_v26 = vmin.u32 %v490_v20, %v1396_v3 }
 0x120   : > { %v586_v34 = vadd.s32 1, %v1402_v16  ;;  %v644_v36 = vsel %vm643_vm4, %v642_v28, 0  ;;  %v392_v42 = vsub.s32 32, %v391_v19  ;;  %v583_v44 = vmul.u32 %v1371_v21, %v567_v35 }
 0x121   : > { %v397_v29 = vadd.s32 127, %v396_v33  ;;  %v646_v38 = vand.u32 31, %v644_v36  ;;  %vm585_vm5 = vc.u32 %v1410_v31, %v1401_v14  ;;  %v492_v46 = vclz %v967_v26 }
 0x122   : > { %v587_v48 = vsel %vm585_vm5, %v586_v34, %v1402_v16  ;;  %v376_v49 = vadd.s32 %v1327_v24, %v1324_v23  ;;  %v632_v52 = vand.u32 2147483647, %v1285_v18  ;;  %v393_v55 = vshll.u32 %v1376_v27, %v391_v19 }
 0x123   : > { %v398_v40 = vshll.u32 %v397_v29, 23  ;;  %v588_v50 = vadd.s32 %v587_v48, %v583_v44  ;;  %v647_v51 = vsub.s32 32, %v646_v38  ;;  %v968_v56 = vadd.s32 4294967294, %v492_v46 }
 0x124   : > { %v394_v32 = vshrl.u32 %v376_v49, %v392_v42  ;;  %v639_v23 = vand.u32 8388607, %v632_v52  ;;  %v649_v27 = vshll.u32 %v1170_v37, %v646_v38  ;;  %v652_v63 = vshll.u32 %v1171_v41, %v646_v38 }
 0x125   : > { %v589_v39 = vadd.s32 536870912, %v588_v50  ;;  %v399_v21 = vor.u32 4788187, %v398_v40  ;;  %v650_v58 = vshrl.u32 %v1171_v41, %v647_v51  ;;  %v653_v59 = vshrl.u32 %v1172_v43, %v647_v51 }
 0x126   : > { %v656_v24 = vshrl.u32 %v1173_v45, %v647_v51  ;;  %v659_v60 = vshrl.u32 %v1174_v47, %v647_v51  ;;  %v395_v61 = vor.u32 %v394_v32, %v393_v55  ;;  %vm969_vm6 = vcmp.lt.s32.totalorder %v968_v56, 0 }
 0x127   : > { %v1423_v57 = vshrl.u32 %v589_v39, 30  ;;  %v645_v0 = vshrl.u32 %v644_v36, 5  ;;  %v655_v4 = vshll.u32 %v1172_v43, %v646_v38  ;;  %v658_v10 = vshll.u32 %v1173_v45, %v646_v38 }
 0x128   : > { %v400_v11 = vand.u32 2147483647, %v399_v21  ;;  %v651_v16 = vor.u32 %v650_v58, %v649_v27  ;;  %v654_v19 = vor.u32 %v653_v59, %v652_v63  ;;  %v661_v25 = vshll.u32 %v1174_v47, %v646_v38 }
 0x129   : > { %v591_v62 = vshll.u32 %v1423_v57, 30  ;;  %v657_v20 = vor.u32 %v656_v24, %v655_v4  ;;  %v660_v22 = vor.u32 %v659_v60, %v658_v10  ;;  %v662_v33 = vshrl.u32 %v1175_v54, %v647_v51 }
 0x12a   : > { %v402_v28 = vcvt.s32.f32 %v395_v61  ;;  %v1438_v26 = vsel %vm969_vm6, 0, %v968_v56  ;;  %v640_v41 = vor.u32 8388608, %v639_v23  ;;  %vm664_vm7 = vcmp.lt.s32.totalorder %v645_v0, 1 }
 0x12b   : > { %v592_v13 = vsub.s32 %v588_v50, %v591_v62  ;;  %v663_v35 = vor.u32 %v662_v33, %v661_v25  ;;  %vm667_vm8 = vcmp.lt.s32.totalorder %v645_v0, 4  ;;  %v672_v45 = vsel %vm664_vm7, %v651_v16, %v654_v19 }
 0x12c   : > { %v403_v43 = vmul.f32 %v402_v28, %v400_v11  ;;  %vm666_vm9 = vcmp.lt.s32.totalorder %v645_v0, 3  ;;  %v673_v29 = vsel %vm667_vm8, %v660_v22, 920167782  ;;  %v676_v36 = vsel %vm664_vm7, %v654_v19, %v657_v20 }
 0x12d   : > { %v594_v30 = vsub.s32 0, %v592_v13  ;;  %v677_v42 = vsel %vm667_vm8, %v663_v35, 1326507024  ;;  %vm665_vm10 = vcmp.lt.s32.totalorder %v645_v0, 2  ;;  %v669_v54 = vsel %vm667_vm8, %v657_v20, 2102212464 }
 0x12e   : > { %v674_v38 = vsel %vm666_vm9, %v657_v20, %v673_v29  ;;  %v648_v44 = vshrl.u32 %v1170_v37, %v647_v51  ;;  %v678_v48 = vsel %vm666_vm9, %v660_v22, %v677_v42  ;;  %v680_v49 = vshll.u32 %v640_v41, 8 }
 0x12f   : > { %v971_v34 = vmin.u32 %v594_v30, %v592_v13  ;;  %v675_v46 = vsel %vm665_vm10, %v672_v45, %v674_v38  ;;  %v404_v40 = vxor.u32 2147483648, %v403_v43  ;;  %v500_v50 = vsub.s32 4294967266, %v1438_v26 }
 0x130   : > { %v679_v39 = vsel %vm665_vm10, %v676_v36, %v678_v48  ;;  %v668_v55 = vsel %vm664_vm7, %v648_v44, %v651_v16  ;;  %v670_v56 = vsel %vm666_vm9, %v654_v19, %v669_v54  ;;  %vm322_vm12 = vcmp.lt.s32.totalorder %v1270_v5, 0 }
 0x131   : > { %v596_v47 = vclz %v971_v34  ;;  %v1450_v21 = vmul.u32.u64.low %v680_v49, %v679_v39  ;;  %v1451_v58 = vmul.u32.u64.high %v680_v49, %v679_v39, %v1450_v21  ;;  %v584_v23 = vadd.s32 %v1401_v14, %v1410_v31 }
 0x132   : > { %v1453_v37 = vmul.u32.u64.low %v680_v49, %v675_v46  ;;  %v1454_v51 = vmul.u32.u64.high %v680_v49, %v675_v46, %v1453_v37  ;;  %v671_v61 = vsel %vm665_vm10, %v668_v55, %v670_v56  ;;  %v405_v62 = vsel %vm322_vm12, %v404_v40, %v403_v43 }
 0x133   : > { %v972_v32 = vadd.s32 4294967294, %v596_v47  ;;  %v501_v27 = vadd.s32 127, %v500_v50  ;;  %vm1468_vm14 = vcmp.le.f32.partialorder %v320_v6, 0.7853982  ;;  %v496_v31 = vsub.s32 32, %v1438_v26 }
 0x134   : > { %vm689_vm13 = vc.u32 %v1451_v58, %v1453_v37  ;;  %v690_v11 = vadd.s32 1, %v1454_v51  ;;  %v687_v0 = vmul.u32 %v680_v49, %v671_v61  ;;  %v408_v16 = vsel %vm1468_vm14, %v1270_v5, %v405_v62 }
 0x135   : > { %vm973_vm11 = vcmp.lt.s32.totalorder %v972_v32, 0  ;;  %v406_v22 = vsub.s32 4, %v1363_v12  ;;  %v480_v6 = vadd.s32 %v1353_v1, %v1359_v7  ;;  %v502_v33 = vshll.u32 %v501_v27, 23 }
 0x136   : > { %v599_v59 = vsel %vm973_vm11, 0, %v972_v32  ;;  %1073 = vcosq.f32 %v408_v16  ;;  %v497_v29 = vshll.u32 %v1396_v3, %v1438_v26  ;;  %v614_v1 = vsub.s32 4, %v1423_v57 }
 0x137   : > { %v600_v24 = vsub.s32 32, %v599_v59  ;;  %v604_v60 = vsub.s32 4294967266, %v599_v59  ;;  %v601_v63 = vshll.u32 %v592_v13, %v599_v59  ;;  %v691_v13 = vsel %vm689_vm13, %v690_v11, %v1454_v51 }
 0x138   : > { %v692_v25 = vadd.s32 %v691_v13, %v687_v0  ;;  %1075 = vsinq.f32 %v408_v16  ;;  %v498_v41 = vshrl.u32 %v480_v6, %v496_v31  ;;  %v407_v34 = vsel %vm322_vm12, %v406_v22, %v1363_v12 }
 0x139   : > { %v602_v4 = vshrl.u32 %v584_v23, %v600_v24  ;;  %v605_v10 = vadd.s32 127, %v604_v60  ;;  %v503_v36 = vor.u32 4788187, %v502_v33  ;;  %vm530_vm15 = vcmp.lt.s32.totalorder %v1282_v15, 0 }
 0x13a   : > { %v693_v30 = vadd.s32 536870912, %v692_v25  ;;  %v499_v47 = vor.u32 %v498_v41, %v497_v29  ;;  %v409_v44 = vsel %vm1468_vm14, 0, %v407_v34  ;;  %vm1494_vm0 = vcmp.le.f32.partialorder %v528_v17, 0.7853982 }
 0x13b   : > { %v603_v19 = vor.u32 %v602_v4, %v601_v63  ;;  %v606_v20 = vshll.u32 %v605_v10, 23  ;;  %v504_v12 = vand.u32 2147483647, %v503_v36  ;;  %v615_v26 = vsel %vm530_vm15, %v614_v1, %v1423_v57 }
 0x13c   : > { %v1483_v45 = vshrl.u32 %v693_v30, 30  ;;  %v506_v40 = vcvt.s32.f32 %v499_v47  ;;  %v413_v50 = vadd.s32 3, %v409_v44  ;;  %v617_v17 = vsel %vm1494_vm0, 0, %v615_v26 }
 0x13d   : > { %v607_v28 = vor.u32 4788187, %v606_v20  ;;  %v610_v43 = vcvt.s32.f32 %v603_v19  ;;  %v621_v59 = vadd.s32 3, %v617_v17  ;;  %vm426_vm1 = vcmp.lt.s32.totalorder %v1274_v8, 0 }
 0x13e   : > { %v695_v7 = vshll.u32 %v1483_v45, 30  ;;  %v507_v56 = vmul.f32 %v506_v40, %v504_v12  ;;  %v414_v51 = vand.u32 3, %v413_v50  ;;  %v688_v61 = vadd.s32 %v1453_v37, %v1451_v58 }
 0x13f   : > { %v608_v35 = vand.u32 2147483647, %v607_v28  ;;  %v622_v27 = vand.u32 3, %v621_v59  ;;  %vm1511_vm6 = vcmp.le.f32.partialorder %v424_v9, 0.7853982  ;;  %vm412_vm10 = vweird.f32 %v1270_v5 }
 0x140   : > { %v696_v38 = vsub.s32 %v692_v25, %v695_v7  ;;  %v1074_v32 = vpop.eup %1073  ;;  %v508_v60 = vxor.u32 2147483648, %v507_v56  ;;  %vm416_vm3 = vcmp.eq.s32.totalorder %v414_v51, 0  ;;  %vm419_vm4 = vcmp.eq.s32.totalorder %v414_v51, 2 }
 0x141   : > { %v611_v42 = vmul.f32 %v610_v43, %v608_v35  ;;  %v420_v24 = vxor.u32 2147483648, %v1074_v32  ;;  %vm415_vm5 = vcmp.lt.s32.totalorder %v414_v51, 2  ;;  %vm627_vm7 = vcmp.eq.s32.totalorder %v622_v27, 2 }
 0x142   : > { %v698_v49 = vsub.s32 0, %v696_v38  ;;  %v1076_v55 = vpop.eup %1075  ;;  %v509_v31 = vsel %vm426_vm1, %v508_v60, %v507_v56  ;;  %vm624_vm8 = vcmp.eq.s32.totalorder %v622_v27, 0  ;;  %vm623_vm9 = vcmp.lt.s32.totalorder %v622_v27, 2  ;;  %v736_v60 = vld [vmem:[%s224_s8] sm:$0xff] }
 0x143   : > { %v612_v54 = vxor.u32 2147483648, %v611_v42  ;;  %v417_v23 = vxor.u32 2147483648, %v1076_v55  ;;  %v421_v11 = vsel %vm419_vm4, %v420_v24, %v1076_v55  ;;  %v512_v28 = vsel %vm1511_vm6, %v1274_v8, %v509_v31 }
 0x144   : > { %v975_v39 = vmin.u32 %v698_v49, %v696_v38  ;;  %vm620_vm11 = vweird.f32 %v1282_v15  ;;  %v510_v35 = vsub.s32 4, %v1391_v53  ;;  %v718_v7 = vsub.s32 4, %v1483_v45 }
 0x145   : > { %v613_v3 = vsel %vm530_vm15, %v612_v54, %v611_v42  ;;  %v418_v10 = vsel %vm416_vm3, %v1074_v32, %v417_v23  ;;  %vm634_vm12 = vcmp.lt.s32.totalorder %v1285_v18, 0  ;;  %vm633_vm13 = vcmp.le.f32.partialorder %v632_v52, 0.7853982 }
 0x146   : > { %v616_v48 = vsel %vm1494_vm0, %v1282_v15, %v613_v3  ;;  %v700_v21 = vclz %v975_v39  ;;  %v422_v37 = vsel %vm415_vm5, %v418_v10, %v421_v11  ;;  %v511_v47 = vsel %vm426_vm1, %v510_v35, %v1391_v53 }
 0x147   : > { %1077 = vcosq.f32 %v616_v48  ;;  %v423_v43 = vsel %vm412_vm10, nan, %v422_v37  ;;  %v719_v54 = vsel %vm634_vm12, %v718_v7, %v1483_v45  ;;  %vm516_vm4 = vweird.f32 %v1274_v8  ;;  %v737_v8 = vld [vmem:[%s224_s8 + $0x8] sm:$0xff] }
 0x148   : > { %1079 = vsinq.f32 %v616_v48  ;;  %v976_v57 = vadd.s32 4294967294, %v700_v21  ;;  %v721_v12 = vsel %vm633_vm13, 0, %v719_v54  ;;  %vm724_vm5 = vweird.f32 %v1285_v18 }
 0x149   : > { %1081 = vcosq.f32 %v512_v28  ;;  %v725_v26 = vadd.s32 3, %v721_v12 }
 0x14a   : > { %vm977_vm2 = vcmp.lt.s32.totalorder %v976_v57, 0  ;;  %1083 = vsinq.f32 %v512_v28 }
 0x14b   : > { %v703_v62 = vsel %vm977_vm2, 0, %v976_v57  ;;  %v726_v50 = vand.u32 3, %v725_v26 }
 0x14c   : > { %v704_v63 = vsub.s32 32, %v703_v62  ;;  %v708_v4 = vsub.s32 4294967266, %v703_v62  ;;  %v705_v16 = vshll.u32 %v696_v38, %v703_v62  ;;  %v513_v38 = vsel %vm1511_vm6, 0, %v511_v47 }
 0x14d   : > { %v517_v46 = vadd.s32 3, %v513_v38  ;;  %vm731_vm1 = vcmp.eq.s32.totalorder %v726_v50, 2  ;;  %vm728_vm2 = vcmp.eq.s32.totalorder %v726_v50, 0  ;;  %vm727_vm3 = vcmp.lt.s32.totalorder %v726_v50, 2 }
 0x14e   : > { %v706_v19 = vshrl.u32 %v688_v61, %v704_v63  ;;  %v709_v20 = vadd.s32 127, %v708_v4  ;;  %vm738_vm6 = vcmask 130048  }
 0x14f   : > { %v518_v48 = vand.u32 3, %v517_v46 }
 0x150   : > { %v707_v25 = vor.u32 %v706_v19, %v705_v16  ;;  %v710_v6 = vshll.u32 %v709_v20, 23 }
 0x151   : > { %v1078_v14 = vpop.eup %1077  ;;  %vm520_vm14 = vcmp.eq.s32.totalorder %v518_v48, 0  ;;  %vm523_vm15 = vcmp.eq.s32.totalorder %v518_v48, 2  ;;  %vm519_vm0 = vcmp.lt.s32.totalorder %v518_v48, 2 }
 0x152   : > { %v1080_v0 = vpop.eup %1079  ;;  %v628_v13 = vxor.u32 2147483648, %v1078_v14  ;;  %v711_v41 = vor.u32 4788187, %v710_v6  ;;  %v714_v36 = vcvt.s32.f32 %v707_v25 }
 0x153   : > { %v625_v22 = vxor.u32 2147483648, %v1080_v0  ;;  %v1082_v3 = vpop.eup %1081 }
 0x154   : > { %v629_v33 = vsel %vm627_vm7, %v628_v13, %v1080_v0  ;;  %v712_v29 = vand.u32 2147483647, %v711_v41  ;;  %v1084_v53 = vpop.eup %1083  ;;  %v524_v40 = vxor.u32 2147483648, %v1082_v3 }
 0x155   : > { %v626_v30 = vsel %vm624_vm8, %v1078_v14, %v625_v22  ;;  %v521_v49 = vxor.u32 2147483648, %v1084_v53 }
 0x156   : > { %v630_v9 = vsel %vm623_vm9, %v626_v30, %v629_v33  ;;  %v715_v1 = vmul.f32 %v714_v36, %v712_v29  ;;  %v525_v32 = vsel %vm523_vm15, %v524_v40, %v1084_v53 }
 0x157   : > { %v631_v34 = vsel %vm620_vm11, nan, %v630_v9  ;;  %v522_v45 = vsel %vm520_vm14, %v1082_v3, %v521_v49 }
 0x158   : > { %v990_v42 = vpack.c.bf16 %v631_v34, %v423_v43  ;;  %v716_v5 = vxor.u32 2147483648, %v715_v1  ;;  %v526_v56 = vsel %vm519_vm0, %v522_v45, %v525_v32 }
 0x159   : > { %v527_v57 = vsel %vm516_vm4, nan, %v526_v56 }
 0x15a   : > { %v717_v15 = vsel %vm634_vm12, %v716_v5, %v715_v1 }
 0x15b   : > { %v720_v44 = vsel %vm633_vm13, %v1285_v18, %v717_v15 }
 0x15c   : > { %1085 = vcosq.f32 %v720_v44 }
 0x15d   : > { %1087 = vsinq.f32 %v720_v44 }
 0x166   : > { %v1086_v52 = vpop.eup %1085 }
 0x167   : > { %v1088_v39 = vpop.eup %1087  ;;  %v732_v17 = vxor.u32 2147483648, %v1086_v52 }
 0x168   : > { %v729_v55 = vxor.u32 2147483648, %v1088_v39 }
 0x169   : > { %v733_v21 = vsel %vm731_vm1, %v732_v17, %v1088_v39 }
 0x16a   : > { %v730_v51 = vsel %vm728_vm2, %v1086_v52, %v729_v55 }
 0x16b   : > { %v734_v59 = vsel %vm727_vm3, %v730_v51, %v733_v21 }
 0x16c   : > { %v735_v23 = vsel %vm724_vm5, nan, %v734_v59 }
 0x16d   : > { %v988_v24 = vpack.c.bf16 %v735_v23, %v527_v57 }
 0x16f   : > { %989 = vmatprep.subr.bf16.mxu1 %v988_v24 }
 0x170   : > { %991 = vmatpush1.bf16.msra.mxu1 %v990_v42 }
 0x173   : > { %978 = vmatmul.mubr.msk.f32.vlgmr.msra.gmra.mrb[0].mxu1 %vm738_vm6, %v736_v60 }
 0x174   : > { %815 = vmatprep.mubr.f32.mxu1 %v1169_v2 }
 0x177   : > { %979 = vmatmul.mubr.msk.f32.gmra.mrb[2].mxu1 %vm738_vm6, %v737_v8 }
 0x246   : > { %v811_v18 = vpop.f32.mrb[0].mxu1 }
 0x247   : > { %822 = vst [vmem:[%s208_s11] sm:$0xff] %v811_v18  ;;  %v813_v61 = vpop.f32.mrb[1].mxu1 }
 0x248   : > { %823 = vst [vmem:[%s208_s11 + $0x8] sm:$0xff] %v813_v61 }
 0x24a   : > { %v817_v62 = vpop.f32.mrb[2].mxu1 }
 0x24b   : > { %824 = vst [vmem:[%s208_s11 + $0x10] sm:$0xff] %v817_v62  ;;  %v819_v2 = vpop.f32.mrb[3].mxu1 }
 0x24c   : > { %825 = vst [vmem:[%s208_s11 + $0x18] sm:$0xff] %v819_v2 }
 0x24d   : > { %1102 = shalt.err (!%p1099_p5)
}
 0x24e   : > { %s1103_s4 = scalar_lea.hbm %s1547_s26, 512  ;;  %s1107_s7 = scalar_lea.hbm %s1598_s3, 1024 }
 0x24f   : > { %p1104_p6 = scmp.ne.s32.totalorder %s1547_s26, %s1103_s4  ;;  %p1108_p10 = scmp.lt.u32.totalorder %s1547_s26, %s1598_s3 }
 0x250   : > { %p1109_p11 = scmp.lt.u32.totalorder %s1107_s7, %s1103_s4  ;;  %p1111_p13 = scmp.lt.u32.totalorder %s1103_s4, %s1547_s26 }
 0x251   : > { %p1105_p7 = pnand %p1104_p6, %p1239_p4 }
 0x252   : > { %p1110_p12 = por %p1109_p11, %p1108_p10 }
 0x253   : > { %p1106_p9 = pneg %p1105_p7 }
 0x254   : > { %p1112_p0 = por %p1111_p13, %p1110_p12 }
 0x256   : > { %p1113_p1 = pnand %p1112_p0, %p1106_p9 }
 0x258   : > { %1116 = shalt.err (!%p1113_p1)
}
 0x259   : > { %s1177_s10 = smov 256   ;;  %s1178_s11 = smov 16  }
 0x25a   : > { %1008 = dma.vmem_to_hbm [thread:$0]  (%p1239_p4), %s1542_s18, 512, %s1547_s26, %s1549_s27, %s1177_s10, %s1177_s10, %s1178_s11  }
 0x25b PF: > { %p1014_p2 = scmp.ge.s32.totalorder %s1167_s17, 2  ;;  %s857_s19 = sand.u32 1, %s1147_s12  }
 0x25c   : > { %s858_s21 = scalar_lea.sflag [#allocation3], %s857_s19 }
 0x25d   : > { %p1011_p3 = pnand %p1014_p2, %p1246_p8 }
 0x25f   : > { %1142 = dma.done.wait (!%p1011_p3), %s858_s21, 512  }
 0x260   : > { %1144 = vsyncadd (!%p1011_p3), %s858_s21, 4294966784  ;;  %s16_s17 = sadd.s32 1, %s1167_s17   ;;  %s1607_s12 = smov %s1151_s13 }
 0x261   : > { %p13_p5 = scmp.ge.s32.totalorder %s16_s17, 4   ;;  %s1608_s13 = smov %s1155_s14 }
 0x262   : > { %s1609_s14 = smov %s1252_s25  ;;  %s1610_s15 = smov %s1163_s16 }
 0x263   : > { %s1611_s16 = smov %s1613_s20  ;;  %15 = sbr.rel (!%p13_p5) target bundleno = 4 (0x4), region = 73 }
 0x26a   :  { %863 = vsyncpa [#allocation3], 1 }
 0x26b   :  { %865 = vsyncpa [#allocation3 + $0x1], 1 }

</bundles_post_ra>
